<compile_context>
chip_gen: v5e
topology: v5e:2x2
jax: 0.10.0
libtpu: 0.0.40
codegen_flags: <defaults>
</compile_context>

<pallas_src>
import functools

import numpy as np
import jax
import jax.numpy as jnp
from jax.experimental import pallas as pl
from jax.experimental.pallas import tpu as pltpu


def _moving_avg_kernel(a_ref, x_ref, o_ref, *, bt):
    # a_ref : (L_out, L)   f32 banded averaging matrix (resident across grid)
    # x_ref : (bt, L,  ct) input block  (time on sublanes, channels on lanes)
    # o_ref : (bt, L_out, ct) output block
    a = a_ref[...]
    for i in range(bt):  # static, unrolled
        xi = x_ref[i].astype(jnp.float32)                      # (L, ct)
        yi = jnp.dot(a, xi,
                     preferred_element_type=jnp.float32,
                     precision=jax.lax.Precision.HIGHEST)       # (L_out, ct)
        o_ref[i] = yi.astype(o_ref.dtype)


def _build_avg_matrix(L, kernel_size, stride, pad, L_out):
    """(L_out, L) f32 matrix: moving-average with replicate padding folded in."""
    A = np.zeros((L_out, L), dtype=np.float32)
    w = 1.0 / float(kernel_size)
    for t in range(L_out):
        for k in range(kernel_size):
            src = min(max(t * stride + k - pad, 0), L - 1)
            A[t, src] += w
    return jnp.asarray(A)


def _chip_vmem():
    """(physical VMEM bytes, per-step tiling budget) — generation aware."""
    cap = 64 * 1024 * 1024  # assume the smallest (v7x) when unknown
    try:
        info = pltpu.get_tpu_info()
        cap = int(getattr(info, "vmem_capacity_bytes", cap)) or cap
    except Exception:
        pass
    # v5e/v6e (128 MiB VMEM): generous 32 MiB tiling budget; v7x (64 MiB): 8 MiB.
    budget = 32 * 1024 * 1024 if cap >= 100 * 1024 * 1024 else 8 * 1024 * 1024
    return cap, budget


def _select_tiles(B, L, C, L_out, itemsize, budget_bytes):
    """Pick (batch_tile, channel_tile) under the VMEM budget."""
    a_bytes = 2 * L_out * L * 4  # resident banded matrix (counted double-buffered)

    def per_step_bytes(bt, ct):
        io = 2 * bt * (L + L_out) * ct * itemsize   # double-buffered in/out blocks
        tmp = (L + L_out) * ct * 4                  # f32 cast + matmul result
        return io + tmp

    # Channel (lane) tile: multiples of 128 when possible, else full dim
    # (required by the last-dim BlockSpec rule for non-multiples).
    if C >= 128 and C % 128 == 0:
        ct = 128
        cand = 256
        while cand <= C:
            if C % cand == 0 and a_bytes + per_step_bytes(1, cand) <= budget_bytes:
                ct = cand
            cand += 128
    else:
        ct = C
    n_c_blocks = C // ct

    # Batch tile: amortize per-grid-step overhead when B is large, but keep
    # >= 4 grid steps for per-core pipelining / the v7x megacore split.
    bt = 1
    for cand in (8, 4, 2):
        if (B % cand == 0
                and (B // cand) * n_c_blocks >= 4
                and a_bytes + per_step_bytes(cand, ct) <= budget_bytes):
            bt = cand
            break
    return bt, ct, a_bytes, per_step_bytes(bt, ct)


@functools.partial(jax.jit, static_argnums=(1, 2))
def moving_avg(x, kernel_size, stride):
    """Pallas implementation of MovingAvg.forward.  x: (B, L, C)."""
    B, L, C = x.shape
    pad = (kernel_size - 1) // 2
    L_pad = L + 2 * pad
    L_out = (L_pad - kernel_size) // stride + 1

    A = _build_avg_matrix(L, kernel_size, stride, pad, L_out)

    itemsize = jnp.dtype(x.dtype).itemsize
    vmem_cap, budget = _chip_vmem()
    bt, ct, a_bytes, step_bytes = _select_tiles(B, L, C, L_out, itemsize, budget)

    grid = (B // bt, C // ct)

    # Explicit VMEM limit with headroom for Mosaic internal scratch; clamped to
    # 3/4 of physical VMEM (<= 48 MiB on v7x, <= 96 MiB on v5e/v6e).
    vmem_limit = int(min(
        max(2 * (a_bytes + step_bytes) + (2 << 20), 32 * 1024 * 1024),
        max(vmem_cap * 3 // 4, 32 * 1024 * 1024)))

    kern = functools.partial(_moving_avg_kernel, bt=bt)

    out = pl.pallas_call(
        kern,
        out_shape=jax.ShapeDtypeStruct((B, L_out, C), x.dtype),
        grid=grid,
        in_specs=[
            pl.BlockSpec((L_out, L), lambda b, j: (0, 0)),       # A: resident
            pl.BlockSpec((bt, L, ct), lambda b, j: (b, 0, j)),   # x block
        ],
        out_specs=pl.BlockSpec((bt, L_out, ct), lambda b, j: (b, 0, j)),
        compiler_params=pltpu.CompilerParams(
            dimension_semantics=("parallel", "parallel"),
            vmem_limit_bytes=vmem_limit,
        ),
    )(A, x)
    return out


def _moving_avg_ref(x, kernel_size, stride):
    # Pure-JAX reference mirroring the PyTorch forward.
    pad = (kernel_size - 1) // 2
    x_pad = jnp.concatenate(
        [jnp.repeat(x[:, :1, :], pad, axis=1), x,
         jnp.repeat(x[:, -1:, :], pad, axis=1)],
        axis=1)
    L_pad = x_pad.shape[1]
    L_out = (L_pad - kernel_size) // stride + 1
    windows = [x_pad[:, t * stride:t * stride + kernel_size, :].mean(axis=1)
               for t in range(L_out)]
    return jnp.stack(windows, axis=1)


if __name__ == "__main__":
    key = jax.random.PRNGKey(0)
    configs = [
        # (B, L, C, kernel_size, stride)
        (2, 8, 16, 5, 1),     # small smoke test
        (4, 96, 7, 25, 1),    # DLinear-style: seq_len=96, 7 channels, K=25
        (2, 16, 5, 4, 1),     # even kernel_size
        (2, 16, 5, 4, 2),     # stride > 1 (handled by the banded matrix)
        (8, 64, 256, 25, 1),  # 128-multiple channels + batch tiling
    ]
    for i, (B, L, C, K, S) in enumerate(configs):
        k = jax.random.fold_in(key, i)
        x = jax.random.normal(k, (B, L, C), dtype=jnp.float32)

        out = jax.block_until_ready(moving_avg(x, K, S))
        ref = _moving_avg_ref(x, K, S)

        assert out.shape == ref.shape, (out.shape, ref.shape)
        err = float(jnp.max(jnp.abs(out - ref)))
        assert err < 1e-4, (
            f"mismatch for config {(B, L, C, K, S)}: max abs err {err}")

    print("KERNEL_OK")
</pallas_src>

<mosaic_0001>
module attributes {stable_mosaic.version = 11 : i64} {
  func.func @_moving_avg_kernel(%arg0: i32, %arg1: i32, %arg2: memref<8x8xf32, #tpu.memory_space<vmem>>, %arg3: memref<1x8x16xf32, #tpu.memory_space<vmem>>, %arg4: memref<1x8x16xf32, #tpu.memory_space<vmem>>) attributes {dimension_semantics = [#tpu.dimension_semantics<parallel>, #tpu.dimension_semantics<parallel>], iteration_bounds = array<i64: 2, 1>, scalar_prefetch = 0 : i64, scratch_operands = 0 : i64, tpu.core_type = #tpu.core_type<tc>, window_params = [{pipeline_mode = #tpu.pipeline_mode<synchronous>, transform_indices = @transform_0, window_bounds = array<i64: 8, 8>}, {transform_indices = @transform_1, window_bounds = array<i64: 1, 8, 16>}, {transform_indices = @transform_2, window_bounds = array<i64: 1, 8, 16>}]} {
    %c0 = arith.constant 0 : index
    %c0_0 = arith.constant 0 : index
    %0 = vector.load %arg2[%c0, %c0_0] : memref<8x8xf32, #tpu.memory_space<vmem>>, vector<8x8xf32>
    %c0_1 = arith.constant 0 : index
    %c0_2 = arith.constant 0 : index
    %c0_3 = arith.constant 0 : index
    %1 = vector.load %arg3[%c0_1, %c0_2, %c0_3] : memref<1x8x16xf32, #tpu.memory_space<vmem>>, vector<1x8x16xf32>
    %2 = vector.shape_cast %1 : vector<1x8x16xf32> to vector<8x16xf32>
    %cst = arith.constant dense<0.000000e+00> : vector<8x16xf32>
    %3 = tpu.matmul %0, %2, %cst {dimension_numbers = #tpu.dot_dimension_numbers<[1], [0], [0], [1], [0, 0, 1, 1], [], []>, precision = #tpu.contract_precision<fp32>} : vector<8x8xf32>, vector<8x16xf32>, vector<8x16xf32> -> vector<8x16xf32>
    %c0_4 = arith.constant 0 : index
    %c0_5 = arith.constant 0 : index
    %c0_6 = arith.constant 0 : index
    %4 = vector.load %arg4[%c0_4, %c0_5, %c0_6] : memref<1x8x16xf32, #tpu.memory_space<vmem>>, vector<1x8x16xf32>
    %5 = vector.shape_cast %4 : vector<1x8x16xf32> to vector<8x16xf32>
    %6 = vector.shape_cast %3 : vector<8x16xf32> to vector<1x8x16xf32>
    tpu.vector_store %arg4[%c0_4, %c0_5, %c0_6], %6 {strides = array<i32>} : memref<1x8x16xf32, #tpu.memory_space<vmem>>, vector<1x8x16xf32>,
    return
  }
  func.func @transform_0(%arg0: i32, %arg1: i32) -> (i32, i32) {
    %c0_i32 = arith.constant 0 : i32
    %c0_i32_0 = arith.constant 0 : i32
    %c0_i32_1 = arith.constant 0 : i32
    return %c0_i32, %c0_i32_0 : i32, i32
  }
  func.func @transform_1(%arg0: i32, %arg1: i32) -> (i32, i32, i32) {
    %c0_i32 = arith.constant 0 : i32
    %c0_i32_0 = arith.constant 0 : i32
    return %arg0, %c0_i32, %arg1 : i32, i32, i32
  }
  func.func @transform_2(%arg0: i32, %arg1: i32) -> (i32, i32, i32) {
    %c0_i32 = arith.constant 0 : i32
    %c0_i32_0 = arith.constant 0 : i32
    return %arg0, %c0_i32, %arg1 : i32, i32, i32
  }
}

</mosaic_0001>

<bundles_post_ra>
// kernel: moving_avg.1
= control target key start
LH: loop header
LB: loop body
LE: loop exit
PB: predicated region body
PF: predicated region fallthrough
CT: control target
= control target key end

     0   :  { %7 = vsyncpa [#allocation3], 0  ;;  %s861_s0 = inlined_call_operand.hbm [shape: f32[8,8], index: 0, kind: input, shape index: {}]   ;;  %s862_s1 = inlined_call_operand.hbm [shape: f32[2,8,16], index: 1, kind: input, shape index: {}]   ;;  %s863_s2 = inlined_call_operand.hbm [shape: f32[2,8,16], index: 2, kind: output, shape index: {}]  }
   0x1   :  { %8 = vsyncpa [#allocation6], 0 }
   0x2   :  { %10 = vsyncpa [#allocation6 + $0x1], 0 }
   0x3   :  { %11 = vsyncpa [#allocation4], 0 }
   0x4   :  { %13 = vsyncpa [#allocation4 + $0x1], 0  ;;  %s708_s9 = smov 0   ;;  %s710_s10 = smov 0  }
   0x5   :  { %s712_s11 = smov 0   ;;  %s714_s12 = smov 0  }
   0x6   :  { %s716_s13 = smov 0   ;;  %s718_s14 = smov 0  }
   0x7 LB: > { %s456_s15 = sadd.s32 4294967295, %s690_s14   ;;  %s457_s16 = sadd.s32 4294967294, %s690_s14   ;;  %s690_s14 = sphi %s718_s14, %s19_s14   ;;  %s686_s13 = sphi %s716_s13, %s875_s13   ;;  %s682_s12 = sphi %s714_s12, %s874_s12   ;;  %s678_s11 = sphi %s712_s11, %s873_s11   ;;  %s674_s10 = sphi %s710_s10, %s872_s10   ;;  %s670_s9 = sphi %s708_s9, %s871_s9  }
   0x8   : > { %p74_p0 = scmp.ne.s32.totalorder %s674_s10, %s670_s9  ;;  %p742_p1 = scmp.eq.s32.totalorder %s456_s15, 0 }
   0x9   : > { %p746_p2 = scmp.eq.s32.totalorder %s456_s15, 1  ;;  %p106_p3 = scmp.eq.s32.totalorder %s457_s16, 1 }
   0xa   : > { %p752_p4 = por %p742_p1, %p74_p0  ;;  %p458_p5 = scmp.ge.s32.totalorder %s690_s14, 1 }
   0xb   : > { %p757_p6 = por %p106_p3, %p74_p0  ;;  %p113_p7 = scmp.lt.s32.totalorder %s690_s14, 3 }
   0xc   : > { %s125_s23 = sshll.u32 %s861_s0, 4  ;;  %p460_p9 = scmp.ge.s32.totalorder %s690_s14, 2  ;;  %s126_s23 = int_to_ptr.hbm [resolvable:$true] %s125_s23 }
   0xd   : > { %p765_p8 = pnand %p458_p5, %p113_p7  ;;  %s692_s25 = smov [#allocation2]  }
   0xe   : > { %s127_s26 = sshll.u32 %s692_s25, 4  ;;  %s31_s27 = sadd.s32 1, %s686_s13  ;;  %s128_s26 = int_to_ptr.vmem [resolvable:$true] %s127_s26 }
   0xf   : > { %p479_p10 = pneg %p765_p8  ;;  %p33_p12 = scmp.ge.s32.totalorder %s31_s27, 2 }
  0x10   : > { %s61_s28 = sadd.s32 1, %s678_s11  ;;  %p68_p13 = scmp.ne.s32.totalorder %s678_s11, %s674_s10 }
  0x11   : > { %p480_p11 = pnand %p479_p10, %p742_p1  ;;  %p69_p0 = scmp.eq.s32.totalorder %s690_s14, 0 }
  0x12   : > { %s877_s27 = smov (%p33_p12, %s31_s27), 0  ;;  %p787_p5 = por %p746_p2, %p68_p13 }
  0x13   : > { %482 = dma.hbm_to_vmem [thread:$0]  (!%p480_p11), %s126_s23, 128, %s128_s26, [#allocation3]  }
  0x14   : > { %p781_p3 = por %p69_p0, %p68_p13  ;;  %s56_s3 = ssub.s32 %s686_s13, %s877_s27 }
  0x15   : > { %p492_p7 = scmp.lt.s32.totalorder %s690_s14, 2  ;;  %p59_p10 = scmp.eq.s32.totalorder %s56_s3, 0 }
  0x16   : > { %s138_s4 = sand.u32 1, %s678_s11   ;;  %s462_s7 = sshll.u32 %s686_s13, 3 }
  0x17   : > { %s461_s5 = sshll.u32 %s138_s4, 3  ;;  %s147_s16 = scalar_lea.hbm %s862_s1, %s462_s7 }
  0x18   : > { %s796_s6 = scalar_select %p59_p10, %s678_s11, %s61_s28  }
  0x19   : > { %s142_s21 = scalar_lea.vmem [#allocation5], %s461_s5  ;;  %s149_s18 = sshll.u32 %s147_s16, 4  ;;  %s150_s18 = int_to_ptr.hbm [resolvable:$true] %s149_s18 }
  0x1a   : > { %s151_s22 = sshll.u32 %s142_s21, 4  ;;  %p484_p2 = pnand %p492_p7, %p781_p3  ;;  %s152_s22 = int_to_ptr.vmem [resolvable:$true] %s151_s22 }
  0x1b   : > { %s139_s23 = scalar_lea.sflag [#allocation6], %s138_s4  ;;  %160 = sbr.rel (%p765_p8) target bundleno = 190 (0xbe), region = 28 }
  0x1c   : > { %486 = dma.hbm_to_vmem [thread:$0]  (!%p484_p2), %s150_s18, 128, %s152_s22, %s139_s23  }
  0x20   : > { %657 = dma.done.wait (%p742_p1), [#allocation3], 128  }
  0x21   : > { %659 = vsyncadd (%p742_p1), [#allocation3], 4294967168  ;;  %s811_s25 = sand.u32 1, %s674_s10  }
  0x22   : > { %s465_s26 = sshll.u32 %s811_s25, 3  ;;  %s168_s28 = scalar_lea.sflag [#allocation6], %s811_s25 }
  0x23   : > { %s171_s29 = scalar_lea.vmem [#allocation5], %s465_s26 }
  0x24   : > { %661 = dma.done.wait (%p752_p4), %s168_s28, 128  }
  0x25   : > { %663 = vsyncadd (%p752_p4), %s168_s28, 4294967168  ;;  %vm195_vm0 = vcmask 64512   ;;  %v194_v0 = vld [vmem:[%s171_s29] sm:$0xff]  ;;  %v193_v1 = vld [vmem:[#allocation2] sm:$0xff]  ;;  %s468_s17 = sshll.u32 %s682_s12, 3  ;;  %s192_s4 = scalar_lea.vmem [#allocation7], %s465_s26 }
  0x26   : > { %v214_v2 = vand.u32 4294901760, %v194_v0  ;;  %v197_v3 = vsel %vm195_vm0, %v193_v1, 0  ;;  %s359_s3 = scalar_lea.hbm %s863_s2, %s468_s17  ;;  %s361_s5 = sshll.u32 %s192_s4, 4  ;;  %vm345_vm1 = vcmask 130048   ;;  %s362_s5 = int_to_ptr.vmem [resolvable:$true] %s361_s5 }
  0x27   : > { %v216_v4 = vand.u32 4294901760, %v197_v3  ;;  %s363_s7 = sshll.u32 %s359_s3, 4  ;;  %s348_s12 = scalar_lea.sflag [#allocation4], %s811_s25  ;;  %s364_s7 = int_to_ptr.hbm [resolvable:$true] %s363_s7 }
  0x28   : > { %v241_v5 = vsub.f32 %v194_v0, %v214_v2  ;;  %291 = vmatpush.msra.mxu3 %v214_v2  ;;  %215 = vmatpush.msra.mxu0 %v214_v2  ;;  %s618_s8 = sshra.s32 %s364_s7, 4  ;;  %s624_s22 = scalar_lea.hbm %s863_s2, 16  ;;  %s619_s8 = int_to_ptr.hbm [resolvable:$true] %s618_s8 }
  0x29   : > { %v217_v6 = vsub.f32 %v197_v3, %v216_v4  ;;  %s620_s15 = scalar_lea.hbm %s619_s8, 8  ;;  %p625_p11 = scmp.lt.s32.totalorder %s619_s8, %s863_s2 }
  0x2a   : > { %268 = vmatpush.msra.mxu2 %v241_v5  ;;  %v242_v7 = vand.u32 4294901760, %v241_v5  ;;  %p621_p1 = scmp.ne.s32.totalorder %s619_s8, %s620_s15  ;;  %p626_p12 = scmp.lt.s32.totalorder %s624_s22, %s620_s15 }
  0x2b   : > { %271 = vmatmul.f32.vlgmr.msra.gmra.mxu2 %v217_v6  ;;  %v218_v8 = vand.u32 4294901760, %v217_v6 }
  0x2c   : > { %v243_v9 = vsub.f32 %v241_v5, %v242_v7  ;;  %317 = vmatpush.msrb.mxu0 %v242_v7  ;;  %p622_p4 = pnand %p621_p1, %p787_p5  ;;  %p627_p13 = por %p626_p12, %p625_p11 }
  0x2d   : > { %295 = vmatmul.f32.vlgmr.msra.gmra.mxu3 %v218_v8  ;;  %v219_v10 = vsub.f32 %v217_v6, %v218_v8 }
  0x2e   : > { %v244_v11 = vand.u32 4294901760, %v243_v9  ;;  %p623_p8 = pneg %p622_p4 }
  0x2f   : > { %v220_v12 = vand.u32 4294901760, %v219_v10 }
  0x30   : > { %245 = vmatpush.msra.mxu1 %v244_v11  ;;  %p628_p0 = pnand %p627_p13, %p623_p8 }
  0x31   : > { %221 = vmatmul.f32.vlgmr.msra.gmra.mxu0 %v220_v12  ;;  %247 = vmatmul.f32.vlgmr.msra.gmra.mxu1 %v216_v4 }
  0x32   : > { %339 = vmatpush.msrb.mxu1 %v214_v2 }
  0x39   : > { %319 = vmatmul.f32.vlgmr.msrb.gmra.mxu0 %v216_v4  ;;  %341 = vmatmul.f32.vlgmr.msrb.gmra.mxu1 %v216_v4 }
  0xae   : > { %v222_v13 = vpop.f32.mrf.mxu0  ;;  %v248_v14 = vpop.f32.mrf.mxu1 }
  0xaf   : > { %v249_v15 = vadd.f32 %v248_v14, %v222_v13  ;;  %v272_v16 = vpop.f32.mrf.mxu2 }
  0xb0   : > { %v296_v18 = vpop.f32.mrf.mxu3 }
  0xb1   : > { %v273_v17 = vadd.f32 %v272_v16, %v249_v15 }
  0xb3   : > { %v297_v19 = vadd.f32 %v296_v18, %v273_v17 }
  0xb6   : > { %v320_v20 = vpop.f32.mrf.mxu0  ;;  %v342_v21 = vpop.f32.mrf.mxu1 }
  0xb7   : > { %v321_v22 = vadd.f32 %v320_v20, %v297_v19 }
  0xb9   : > { %v343_v23 = vadd.f32 %v342_v21, %v321_v22 }
  0xbb   : > { %346 = vst.msk [vmem:[%s192_s4] sm:$0xff] %vm345_vm1, %v343_v23 }
  0xbc   : > { %631 = shalt.err (!%p628_p0)
}
  0xbd   : > { %477 = dma.vmem_to_hbm [thread:$0]  (%p787_p5), %s362_s5, 128, %s364_s7, %s348_s12  }
  0xbe PF: > { %s375_s25 = sand.u32 1, %s670_s9   ;;  %p488_p3 = pnand %p460_p9, %p757_p6 }
  0xbf   : > { %s376_s26 = scalar_lea.sflag [#allocation4], %s375_s25 }
  0xc0   : > { %p489_p7 = pneg %p488_p3 }
  0xc2   : > { %665 = dma.done.wait (%p489_p7), %s376_s26, 128  }
  0xc3   : > { %667 = vsyncadd (%p489_p7), %s376_s26, 4294967168  ;;  %s19_s14 = sadd.s32 1, %s690_s14   ;;  %s871_s9 = smov %s674_s10 }
  0xc4   : > { %p16_p10 = scmp.ge.s32.totalorder %s19_s14, 4   ;;  %s872_s10 = smov %s678_s11 }
  0xc5   : > { %s873_s11 = smov %s796_s6  ;;  %s874_s12 = smov %s686_s13 }
  0xc6   : > { %s875_s13 = smov %s877_s27  ;;  %18 = sbr.rel (!%p16_p10) target bundleno = 7 (0x7), region = 78 }
  0xcb   :  { %382 = vsyncpa [#allocation3], 1 }
  0xcc   :  { %384 = vsyncpa [#allocation3 + $0x1], 1 }
  0xcd   :  { %385 = vsyncpa [#allocation6], 1 }
  0xce   :  { %387 = vsyncpa [#allocation6 + $0x1], 1 }
  0xcf   :  { %388 = vsyncpa [#allocation4], 1 }
  0xd0   :  { %390 = vsyncpa [#allocation4 + $0x1], 1 }

</bundles_post_ra>
